<compile_context>
chip_gen: v7x
topology: tpu7x:2x2x1
jax: 0.10.0
libtpu: 0.0.40
codegen_flags: <defaults>
</compile_context>

<pallas_src>
import jax
import jax.numpy as jnp
from jax.experimental import pallas as pl
from jax.experimental.pallas import tpu as pltpu


def spa_attention_kernel(x_ref, w1_ref, b1_ref, w2_ref, o_ref):
    # x_ref:  (bb, C, HW)  bf16  batch block, channels-major (free reshape of NCHW)
    # w1_ref: (64, C)      bf16  conv1 weight with BN1 scale folded in
    # b1_ref: (64, 1)      f32   folded BN1 bias
    # w2_ref: (k, 64)      f32   conv2 weight with BN2 scale folded in
    # o_ref:  (bb, k, HW)  f32   softmax attention maps
    bb = x_ref.shape[0]
    w1 = w1_ref[...]
    b1 = b1_ref[...]
    w2 = w2_ref[...]
    for i in range(bb):  # static unroll over the (small) batch block
        # conv1 (1x1) + BN1 + ReLU, transposed: (64,C)@(C,HW) -> (64,HW), f32 acc
        h = jnp.dot(w1, x_ref[i], preferred_element_type=jnp.float32)
        h = jnp.maximum(h + b1, 0.0)
        # conv2 (1x1) + BN2 scale: (k,64)@(64,HW) -> (k,HW) == view(k, H*W)
        a = jnp.dot(w2, h, preferred_element_type=jnp.float32)
        # softmax over the spatial (lane) axis
        m = jnp.max(a, axis=-1, keepdims=True)
        e = jnp.exp(a - m)
        denom = jnp.sum(e, axis=-1, keepdims=True)
        o_ref[i] = (e * pl.reciprocal(denom, approx=True)).astype(o_ref.dtype)


def spa_attention(x_nchw, w1, bn1, w2, bn2, *, k, height, width,
                  matmul_dtype=jnp.bfloat16):
    """x_nchw: (B, 2048, H, W) float32.  Returns (B, k, H*W) float32."""
    B, C, H, W = x_nchw.shape
    assert (H, W) == (height, width)
    HW = H * W
    C_mid = w1.shape[0]  # 64

    # NCHW -> (B, C, HW): a free reshape (no HBM transpose pass).
    # bf16 halves the kernel's x DMA traffic and uses the native bf16 MXU path;
    # in a full model this convert fuses with the producer of x.
    x = x_nchw.reshape(B, C, HW).astype(matmul_dtype)

    # Fold eval-mode BatchNorm into per-channel scale/bias, then into weights.
    def fold_bn(bn):
        gamma, beta, mean, var, eps = bn
        scale = gamma / jnp.sqrt(var + eps)
        return scale, beta - mean * scale

    s1, b1 = fold_bn(bn1)
    s2, _b2 = fold_bn(bn2)  # BN2 bias is constant per k row -> cancels in softmax

    w1f = (w1.reshape(C_mid, C) * s1[:, None]).astype(matmul_dtype)  # (64, C)
    b1f = b1.reshape(C_mid, 1).astype(jnp.float32)                   # (64, 1)
    w2f = (w2.reshape(k, C_mid) * s2[:, None]).astype(jnp.float32)   # (k, 64)

    # Batch blocking: at most 2 "parallel" grid steps (both TensorCores on v7x);
    # per-step tiles fatten with B so pipeline overhead is amortized.
    num_blocks = 2 if (B > 1 and B % 2 == 0) else 1
    bb = B // num_blocks

    grid_spec = pltpu.PrefetchScalarGridSpec(
        num_scalar_prefetch=0,
        grid=(num_blocks,),
        in_specs=[
            pl.BlockSpec((bb, C, HW), lambda g: (g, 0, 0)),
            pl.BlockSpec((C_mid, C), lambda g: (0, 0)),
            pl.BlockSpec((C_mid, 1), lambda g: (0, 0)),
            pl.BlockSpec((k, C_mid), lambda g: (0, 0)),
        ],
        out_specs=pl.BlockSpec((bb, k, HW), lambda g: (g, 0, 0)),
    )

    return pl.pallas_call(
        spa_attention_kernel,
        out_shape=jax.ShapeDtypeStruct((B, k, HW), jnp.float32),
        grid_spec=grid_spec,
        compiler_params=pltpu.CompilerParams(
            dimension_semantics=("parallel",)),
    )(x, w1f, b1f, w2f)


def reference(x_nchw, w1, bn1, w2, bn2, *, k, height, width,
              matmul_dtype=jnp.bfloat16):
    """Pure-JAX reference with matched numerics (eval-mode BN, bf16 first matmul)."""
    B, C, H, W = x_nchw.shape
    HW = H * W
    C_mid = w1.shape[0]
    x = x_nchw.reshape(B, C, HW).astype(matmul_dtype)

    def fold_bn(bn):
        gamma, beta, mean, var, eps = bn
        scale = gamma / jnp.sqrt(var + eps)
        return scale, beta - mean * scale

    s1, b1 = fold_bn(bn1)
    s2, b2 = fold_bn(bn2)
    w1f = (w1.reshape(C_mid, C) * s1[:, None]).astype(matmul_dtype)
    w2f = w2.reshape(k, C_mid) * s2[:, None]

    h = jnp.einsum('oc,bcs->bos', w1f, x, preferred_element_type=jnp.float32)
    h = jnp.maximum(h + b1[None, :, None], 0.0)
    a = jnp.einsum('ko,bos->bks', w2f, h, preferred_element_type=jnp.float32)
    a = a + b2[None, :, None]  # kept in the reference; cancels in the softmax
    return jax.nn.softmax(a, axis=-1)


if __name__ == "__main__":
    # Module hyperparameters (SpaAttention.__init__ defaults).
    num_features, k, height, width = 128, 3, 12, 4
    B, C_in, C_mid = 2, 2048, 64

    key = jax.random.PRNGKey(0)
    kx, kw1, kw2 = jax.random.split(key, 3)

    # Input (NCHW, as the PyTorch module expects).
    x = jax.random.normal(kx, (B, C_in, height, width), dtype=jnp.float32)

    # conv weights: kaiming_normal(mode='fan_out'):
    #   conv1 weight (64, 2048, 1, 1): fan_out = 64  -> std = sqrt(2/64)
    #   conv2 weight (k,   64,  1, 1): fan_out = k   -> std = sqrt(2/k)
    w1 = jax.random.normal(kw1, (C_mid, C_in, 1, 1), jnp.float32) * jnp.sqrt(2.0 / C_mid)
    w2 = jax.random.normal(kw2, (k, C_mid, 1, 1), jnp.float32) * jnp.sqrt(2.0 / k)

    # BatchNorm params from reset_params(): gamma=1, beta=0; fresh running stats.
    bn1 = (jnp.ones((C_mid,), jnp.float32), jnp.zeros((C_mid,), jnp.float32),
           jnp.zeros((C_mid,), jnp.float32), jnp.ones((C_mid,), jnp.float32), 1e-5)
    bn2 = (jnp.ones((k,), jnp.float32), jnp.zeros((k,), jnp.float32),
           jnp.zeros((k,), jnp.float32), jnp.ones((k,), jnp.float32), 1e-5)

    out = spa_attention(x, w1, bn1, w2, bn2, k=k, height=height, width=width)
    out = jax.block_until_ready(out)

    ref = reference(x, w1, bn1, w2, bn2, k=k, height=height, width=width)
    assert out.shape == (B, k, height * width)
    assert jnp.allclose(out, ref, atol=2e-3, rtol=0), "mismatch vs reference"
    # rows of a softmax must sum to ~1 (approx reciprocal in the epilogue)
    assert jnp.allclose(jnp.sum(out, axis=-1), 1.0, atol=2e-3)

    print("KERNEL_OK")
</pallas_src>

<mosaic_0001>
module attributes {stable_mosaic.version = 11 : i64} {
  func.func @spa_attention_kernel(%arg0: i32, %arg1: memref<1x2048x48xbf16, #tpu.memory_space<vmem>>, %arg2: memref<64x2048xbf16, #tpu.memory_space<vmem>>, %arg3: memref<64x1xf32, #tpu.memory_space<vmem>>, %arg4: memref<3x64xf32, #tpu.memory_space<vmem>>, %arg5: memref<1x3x48xf32, #tpu.memory_space<vmem>>) attributes {dimension_semantics = [#tpu.dimension_semantics<parallel>], iteration_bounds = array<i64: 2>, scalar_prefetch = 0 : i64, scratch_operands = 0 : i64, tpu.core_type = #tpu.core_type<tc>, window_params = [{transform_indices = @transform_0, window_bounds = array<i64: 1, 2048, 48>}, {pipeline_mode = #tpu.pipeline_mode<synchronous>, transform_indices = @transform_1, window_bounds = array<i64: 64, 2048>}, {pipeline_mode = #tpu.pipeline_mode<synchronous>, transform_indices = @transform_2, window_bounds = array<i64: 64, 1>}, {pipeline_mode = #tpu.pipeline_mode<synchronous>, transform_indices = @transform_3, window_bounds = array<i64: 3, 64>}, {transform_indices = @transform_4, window_bounds = array<i64: 1, 3, 48>}]} {
    %c0 = arith.constant 0 : index
    %c0_0 = arith.constant 0 : index
    %0 = vector.load %arg2[%c0, %c0_0] : memref<64x2048xbf16, #tpu.memory_space<vmem>>, vector<64x2048xbf16>
    %c0_1 = arith.constant 0 : index
    %c0_2 = arith.constant 0 : index
    %1 = vector.load %arg3[%c0_1, %c0_2] : memref<64x1xf32, #tpu.memory_space<vmem>>, vector<64x1xf32>
    %c0_3 = arith.constant 0 : index
    %c0_4 = arith.constant 0 : index
    %2 = vector.load %arg4[%c0_3, %c0_4] : memref<3x64xf32, #tpu.memory_space<vmem>>, vector<3x64xf32>
    %c0_5 = arith.constant 0 : index
    %c0_6 = arith.constant 0 : index
    %c0_7 = arith.constant 0 : index
    %3 = vector.load %arg1[%c0_5, %c0_6, %c0_7] : memref<1x2048x48xbf16, #tpu.memory_space<vmem>>, vector<1x2048x48xbf16>
    %4 = vector.shape_cast %3 : vector<1x2048x48xbf16> to vector<2048x48xbf16>
    %cst = arith.constant dense<0.000000e+00> : vector<64x48xf32>
    %5 = tpu.matmul %0, %4, %cst {dimension_numbers = #tpu.dot_dimension_numbers<[1], [0], [0], [1], [0, 0, 1, 1], [], []>} : vector<64x2048xbf16>, vector<2048x48xbf16>, vector<64x48xf32> -> vector<64x48xf32>
    %6 = vector.broadcast %1 : vector<64x1xf32> to vector<64x48xf32>
    %7 = arith.addf %5, %6 : vector<64x48xf32>
    %cst_8 = arith.constant 0.000000e+00 : f32
    %8 = vector.broadcast %cst_8 : f32 to vector<64x48xf32>
    %9 = arith.maximumf %7, %8 : vector<64x48xf32>
    %cst_9 = arith.constant dense<0.000000e+00> : vector<3x48xf32>
    %10 = tpu.matmul %2, %9, %cst_9 {dimension_numbers = #tpu.dot_dimension_numbers<[1], [0], [0], [1], [0, 0, 1, 1], [], []>} : vector<3x64xf32>, vector<64x48xf32>, vector<3x48xf32> -> vector<3x48xf32>
    %cst_10 = arith.constant dense<0xFF800000> : vector<3xf32>
    %11 = vector.multi_reduction <maximumf>, %10, %cst_10 [1] : vector<3x48xf32> to vector<3xf32>
    %12 = vector.shape_cast %11 : vector<3xf32> to vector<3x1xf32>
    %13 = vector.broadcast %12 : vector<3x1xf32> to vector<3x48xf32>
    %14 = arith.subf %10, %13 : vector<3x48xf32>
    %15 = math.exp %14 : vector<3x48xf32>
    %cst_11 = arith.constant dense<0.000000e+00> : vector<3xf32>
    %16 = vector.multi_reduction <add>, %15, %cst_11 [1] : vector<3x48xf32> to vector<3xf32>
    %17 = vector.shape_cast %16 : vector<3xf32> to vector<3x1xf32>
    %18 = tpu.reciprocal %17 {approx = true} : vector<3x1xf32> -> vector<3x1xf32>
    %19 = vector.broadcast %18 : vector<3x1xf32> to vector<3x48xf32>
    %20 = arith.mulf %15, %19 : vector<3x48xf32>
    %c0_12 = arith.constant 0 : index
    %c0_13 = arith.constant 0 : index
    %c0_14 = arith.constant 0 : index
    %21 = vector.load %arg5[%c0_12, %c0_13, %c0_14] : memref<1x3x48xf32, #tpu.memory_space<vmem>>, vector<1x3x48xf32>
    %22 = vector.shape_cast %21 : vector<1x3x48xf32> to vector<3x48xf32>
    %23 = vector.shape_cast %20 : vector<3x48xf32> to vector<1x3x48xf32>
    tpu.vector_store %arg5[%c0_12, %c0_13, %c0_14], %23 {strides = array<i32>} : memref<1x3x48xf32, #tpu.memory_space<vmem>>, vector<1x3x48xf32>,
    return
  }
  func.func @transform_0(%arg0: i32) -> (i32, i32, i32) {
    %c0_i32 = arith.constant 0 : i32
    %c0_i32_0 = arith.constant 0 : i32
    %c0_i32_1 = arith.constant 0 : i32
    return %arg0, %c0_i32, %c0_i32_0 : i32, i32, i32
  }
  func.func @transform_1(%arg0: i32) -> (i32, i32) {
    %c0_i32 = arith.constant 0 : i32
    %c0_i32_0 = arith.constant 0 : i32
    %c0_i32_1 = arith.constant 0 : i32
    return %c0_i32, %c0_i32_0 : i32, i32
  }
  func.func @transform_2(%arg0: i32) -> (i32, i32) {
    %c0_i32 = arith.constant 0 : i32
    %c0_i32_0 = arith.constant 0 : i32
    %c0_i32_1 = arith.constant 0 : i32
    return %c0_i32, %c0_i32_0 : i32, i32
  }
  func.func @transform_3(%arg0: i32) -> (i32, i32) {
    %c0_i32 = arith.constant 0 : i32
    %c0_i32_0 = arith.constant 0 : i32
    %c0_i32_1 = arith.constant 0 : i32
    return %c0_i32, %c0_i32_0 : i32, i32
  }
  func.func @transform_4(%arg0: i32) -> (i32, i32, i32) {
    %c0_i32 = arith.constant 0 : i32
    %c0_i32_0 = arith.constant 0 : i32
    %c0_i32_1 = arith.constant 0 : i32
    return %arg0, %c0_i32, %c0_i32_0 : i32, i32, i32
  }
}

</mosaic_0001>

<bundles_post_ra>
// kernel: tpu_custom_call.1
= control target key start
LH: loop header
LB: loop body
LE: loop exit
PB: predicated region body
PF: predicated region fallthrough
CT: control target
= control target key end

     0   :  { %s3069_s15 = smov 0   ;;  %s3498_s0 = inlined_call_operand.vmem [shape: bf16[2,2048,48], index: 0, kind: input, shape index: {}]   ;;  %s3499_s1 = inlined_call_operand.vmem [shape: bf16[64,2048], index: 1, kind: input, shape index: {}]   ;;  %s3500_s2 = inlined_call_operand.vmem [shape: f32[64,1], index: 2, kind: input, shape index: {}]   ;;  %s3501_s3 = inlined_call_operand.vmem [shape: f32[3,64], index: 3, kind: input, shape index: {}]   ;;  %s3502_s4 = inlined_call_operand.vmem [shape: f32[2,3,48], index: 4, kind: output, shape index: {}]  }
   0x1 LB: > { %s2322_s16 = sadd.s32 4294967295, %s3038_s15   ;;  %p2326_p0 = scmp.ge.s32.totalorder %s3038_s15, 1  ;;  %s3038_s15 = sphi %s3069_s15, %s14_s15  }
   0x2   : > { %p162_p1 = scmp.lt.s32.totalorder %s3038_s15, 3 }
   0x4   : > { %p163_p2 = pnand %p2326_p0, %p162_p1 }
   0x5   : > { %p187_p3 = scmp.lt.s32.totalorder (!%p163_p2), %s2322_s16, 1  ;;  %v3080_v0 = vld [vmem:[%s3499_s1] sm:$0xff] (!%p163_p2)  ;;  %v3090_v2 = vld [vmem:[%s3499_s1 + $0x8] sm:$0xff] (!%p163_p2)  ;;  %v3040_v7 = vmov (!%p163_p2), 0   ;;  %vm3042_vm0 = vmmov (!%p163_p2), 0   ;;  %vm2182_vm1 = vcmask (!%p163_p2), 523264  }
   0x6   : > { %166 = sbr.rel (%p163_p2) target bundleno = 925 (0x39d), region = 36  ;;  %v3085_v1 = vld [vmem:[%s3499_s1 + $0x40] sm:$0xff] (!%p163_p2)  ;;  %v3097_v4 = vld [vmem:[%s3499_s1 + $0x48] sm:$0xff] (!%p163_p2)  ;;  %2898 = vset.pattern.permute.xlu0 (!%p163_p2), %v3040_v7  ;;  %2899 = vset.pattern.permute.xlu1 (!%p163_p2), %v3040_v7  ;;  %vm2256_vm2 = vcmask (!%p163_p2), 387072  }
   0x7   : > { %v2331_v3 = vcombine.high (!%p163_p2), %v3080_v0, %v3085_v1  ;;  %v2333_v5 = vcombine.high (!%p163_p2), %v3090_v2, %v3097_v4  ;;  %v213_v36 = vld [vmem:[%s3499_s1 + $0x80] sm:$0xff] (!%p163_p2)  ;;  %v214_v39 = vld [vmem:[%s3499_s1 + $0x88] sm:$0xff] (!%p163_p2)  ;;  %v2330_v43 = vcombine.low (!%p163_p2), %v3080_v0, %v3085_v1  ;;  %v2332_v44 = vcombine.low (!%p163_p2), %v3090_v2, %v3097_v4 }
   0x8   : > { %v221_v37 = vld [vmem:[%s3499_s1 + $0xc0] sm:$0xff] (!%p163_p2)  ;;  %v222_v40 = vld [vmem:[%s3499_s1 + $0xc8] sm:$0xff] (!%p163_p2) }
   0x9   : > { %1686 = vmatprep.mubr.bf16.mxu0 (!%p163_p2), %v2331_v3  ;;  %1751 = vmatprep.mubr.bf16.mxu1 (!%p163_p2), %v2333_v5  ;;  %v2347_v47 = vcombine.high (!%p163_p2), %v213_v36, %v221_v37  ;;  %v2349_v49 = vcombine.high (!%p163_p2), %v214_v39, %v222_v40  ;;  %v229_v52 = vld [vmem:[%s3499_s1 + $0x100] sm:$0xff] (!%p163_p2)  ;;  %v230_v55 = vld [vmem:[%s3499_s1 + $0x108] sm:$0xff] (!%p163_p2)  ;;  %v2346_v59 = vcombine.low (!%p163_p2), %v213_v36, %v221_v37  ;;  %v200_v37 = vld [vmem:[%s3499_s1 + $0x18] sm:$0xff] (!%p163_p2) }
   0xa   : > { %v237_v53 = vld [vmem:[%s3499_s1 + $0x140] sm:$0xff] (!%p163_p2)  ;;  %v238_v56 = vld [vmem:[%s3499_s1 + $0x148] sm:$0xff] (!%p163_p2)  ;;  %v2348_v60 = vcombine.low (!%p163_p2), %v214_v39, %v222_v40 }
   0xb   : > { %v2363_v63 = vcombine.high (!%p163_p2), %v229_v52, %v237_v53  ;;  %v2365_v1 = vcombine.high (!%p163_p2), %v230_v55, %v238_v56  ;;  %v245_v4 = vld [vmem:[%s3499_s1 + $0x180] sm:$0xff] (!%p163_p2)  ;;  %v246_v7 = vld [vmem:[%s3499_s1 + $0x188] sm:$0xff] (!%p163_p2) }
   0xc   : > { %v253_v5 = vld [vmem:[%s3499_s1 + $0x1c0] sm:$0xff] (!%p163_p2) }
   0xd   : > { %s3504_s16 = smov (!%p187_p3, %s2322_s16), 1 }
   0xe   : > { %s2525_s25 = sshll.u32 %s3504_s16, 10  ;;  %s2329_s26 = sshll.u32 %s3504_s16, 2 }
   0xf   : > { %s3107_s28 = scalar_lea.vmem %s3498_s0, %s2525_s25  ;;  %s195_s30 = scalar_lea.vmem %s3502_s4, %s2329_s26 }
  0x10   : > { %v2900_v6 = vld [vmem:[%s3107_s28 + $0x40] sm:$0xff]   ;;  %v2904_v11 = vld [vmem:[%s3107_s28 + $0x48] sm:$0xff]   ;;  %v2908_v15 = vld [vmem:[%s3107_s28 + $0x50] sm:$0xff]  }
  0x11   : > { %v2901_v8 = vld [vmem:[%s3107_s28 + $0xc0] sm:$0xff]   ;;  %2526 = vmatprep.subr.bf16.mxu0 %v2900_v6  ;;  %v2905_v12 = vld [vmem:[%s3107_s28 + $0xc8] sm:$0xff]   ;;  %v2909_v16 = vld [vmem:[%s3107_s28 + $0xd0] sm:$0xff]  }
  0x12   : > { %v2902_v9 = vld [vmem:[%s3107_s28] sm:$0xff]   ;;  %2566 = vmatprep.subr.bf16.mxu1 %v2901_v8  ;;  %v2906_v13 = vld [vmem:[%s3107_s28 + $0x8] sm:$0xff]   ;;  %v2910_v17 = vld [vmem:[%s3107_s28 + $0x10] sm:$0xff]  }
  0x13   : > { %v2903_v10 = vld [vmem:[%s3107_s28 + $0x80] sm:$0xff]   ;;  %2527 = vmatpush3.bf16.msra.mxu0 %v2902_v9  ;;  %v2907_v14 = vld [vmem:[%s3107_s28 + $0x88] sm:$0xff]   ;;  %v2911_v18 = vld [vmem:[%s3107_s28 + $0x90] sm:$0xff]  }
  0x14   : > { %2567 = vmatpush3.bf16.msra.mxu1 %v2903_v10  ;;  %2528 = vmatprep.subr.bf16.mxu0 %v2904_v11  ;;  %v2912_v19 = vld [vmem:[%s3107_s28 + $0x58] sm:$0xff]   ;;  %v2916_v23 = vld [vmem:[%s3107_s28 + $0x60] sm:$0xff]   ;;  %v2920_v27 = vld [vmem:[%s3107_s28 + $0x68] sm:$0xff]   ;;  %v2362_v11 = vcombine.low %v229_v52, %v237_v53 }
  0x15   : > { %2568 = vmatprep.subr.bf16.mxu1 %v2905_v12  ;;  %v2913_v20 = vld [vmem:[%s3107_s28 + $0xd8] sm:$0xff]   ;;  %v2917_v24 = vld [vmem:[%s3107_s28 + $0xe0] sm:$0xff]   ;;  %v2921_v28 = vld [vmem:[%s3107_s28 + $0xe8] sm:$0xff]   ;;  %v2364_v12 = vcombine.low %v230_v55, %v238_v56 }
  0x16   : > { %v2914_v21 = vld [vmem:[%s3107_s28 + $0x18] sm:$0xff]   ;;  %v2918_v25 = vld [vmem:[%s3107_s28 + $0x20] sm:$0xff]   ;;  %v2922_v29 = vld [vmem:[%s3107_s28 + $0x28] sm:$0xff]  }
  0x17   : > { %2529 = vmatpush3.bf16.msra.mxu0 %v2906_v13  ;;  %v2915_v22 = vld [vmem:[%s3107_s28 + $0x98] sm:$0xff]   ;;  %v2919_v26 = vld [vmem:[%s3107_s28 + $0xa0] sm:$0xff]   ;;  %v2923_v30 = vld [vmem:[%s3107_s28 + $0xa8] sm:$0xff]  }
  0x18   : > { %2569 = vmatpush3.bf16.msra.mxu1 %v2907_v14  ;;  %2530 = vmatprep.subr.bf16.mxu0 %v2908_v15  ;;  %v2924_v31 = vld [vmem:[%s3107_s28 + $0x70] sm:$0xff]   ;;  %v2928_v35 = vld [vmem:[%s3107_s28 + $0x78] sm:$0xff]   ;;  %v2932_v45 = vld [vmem:[%s3107_s28 + $0x140] sm:$0xff]   ;;  %v2379_v15 = vcombine.high %v245_v4, %v253_v5 }
  0x19   : > { %2570 = vmatprep.subr.bf16.mxu1 %v2909_v16  ;;  %v2925_v32 = vld [vmem:[%s3107_s28 + $0xf0] sm:$0xff]   ;;  %v2929_v38 = vld [vmem:[%s3107_s28 + $0xf8] sm:$0xff]   ;;  %v2933_v46 = vld [vmem:[%s3107_s28 + $0x1c0] sm:$0xff]  }
  0x1a   : > { %v2926_v33 = vld [vmem:[%s3107_s28 + $0x30] sm:$0xff]   ;;  %v2930_v41 = vld [vmem:[%s3107_s28 + $0x38] sm:$0xff]   ;;  %v2934_v48 = vld [vmem:[%s3107_s28 + $0x100] sm:$0xff]  }
  0x1b   : > { %2531 = vmatpush3.bf16.msra.mxu0 %v2910_v17  ;;  %v2927_v34 = vld [vmem:[%s3107_s28 + $0xb0] sm:$0xff]   ;;  %v2931_v42 = vld [vmem:[%s3107_s28 + $0xb8] sm:$0xff]   ;;  %v2935_v50 = vld [vmem:[%s3107_s28 + $0x180] sm:$0xff]  }
  0x1c   : > { %2571 = vmatpush3.bf16.msra.mxu1 %v2911_v18  ;;  %2532 = vmatprep.subr.bf16.mxu0 %v2912_v19  ;;  %v2936_v51 = vld [vmem:[%s3107_s28 + $0x148] sm:$0xff]   ;;  %v2940_v61 = vld [vmem:[%s3107_s28 + $0x150] sm:$0xff]   ;;  %v2944_v3 = vld [vmem:[%s3107_s28 + $0x158] sm:$0xff]  }
  0x1d   : > { %2572 = vmatprep.subr.bf16.mxu1 %v2913_v20  ;;  %v2937_v54 = vld [vmem:[%s3107_s28 + $0x1c8] sm:$0xff]   ;;  %v2941_v62 = vld [vmem:[%s3107_s28 + $0x1d0] sm:$0xff]   ;;  %v2945_v6 = vld [vmem:[%s3107_s28 + $0x1d8] sm:$0xff]  }
  0x1e   : > { %v2938_v57 = vld [vmem:[%s3107_s28 + $0x108] sm:$0xff]   ;;  %v2942_v0 = vld [vmem:[%s3107_s28 + $0x110] sm:$0xff]   ;;  %v2946_v9 = vld [vmem:[%s3107_s28 + $0x118] sm:$0xff]  }
  0x1f   : > { %2533 = vmatpush3.bf16.msra.mxu0 %v2914_v21  ;;  %v2939_v58 = vld [vmem:[%s3107_s28 + $0x188] sm:$0xff]   ;;  %v2943_v2 = vld [vmem:[%s3107_s28 + $0x190] sm:$0xff]   ;;  %v2947_v10 = vld [vmem:[%s3107_s28 + $0x198] sm:$0xff]  }
  0x20   : > { %2573 = vmatpush3.bf16.msra.mxu1 %v2915_v22  ;;  %2534 = vmatprep.subr.bf16.mxu0 %v2916_v23  ;;  %v254_v8 = vld [vmem:[%s3499_s1 + $0x1c8] sm:$0xff]  ;;  %v2948_v13 = vld [vmem:[%s3107_s28 + $0x160] sm:$0xff]   ;;  %v199_v20 = vld [vmem:[%s3499_s1 + $0x10] sm:$0xff] }
  0x21   : > { %2574 = vmatprep.subr.bf16.mxu1 %v2917_v24  ;;  %v2949_v14 = vld [vmem:[%s3107_s28 + $0x1e0] sm:$0xff]   ;;  %v2381_v17 = vcombine.high %v246_v7, %v254_v8  ;;  %v2952_v19 = vld [vmem:[%s3107_s28 + $0x168] sm:$0xff]   ;;  %v207_v21 = vld [vmem:[%s3499_s1 + $0x50] sm:$0xff] }
  0x22   : > { %v2950_v16 = vld [vmem:[%s3107_s28 + $0x120] sm:$0xff]   ;;  %v2953_v22 = vld [vmem:[%s3107_s28 + $0x1e8] sm:$0xff]   ;;  %v2334_v36 = vcombine.low %v199_v20, %v207_v21  ;;  %v224_v52 = vld [vmem:[%s3499_s1 + $0xd8] sm:$0xff] }
  0x23   : > { %2535 = vmatpush3.bf16.msra.mxu0 %v2918_v25  ;;  %v2951_v18 = vld [vmem:[%s3107_s28 + $0x1a0] sm:$0xff]   ;;  %v2954_v23 = vld [vmem:[%s3107_s28 + $0x128] sm:$0xff]   ;;  %v2378_v25 = vcombine.low %v245_v4, %v253_v5  ;;  %v240_v5 = vld [vmem:[%s3499_s1 + $0x158] sm:$0xff] }
  0x24   : > { %2575 = vmatpush3.bf16.msra.mxu1 %v2919_v26  ;;  %2536 = vmatprep.subr.bf16.mxu0 %v2920_v27  ;;  %v2955_v24 = vld [vmem:[%s3107_s28 + $0x1a8] sm:$0xff]   ;;  %v2380_v26 = vcombine.low %v246_v7, %v254_v8  ;;  %v2956_v27 = vld [vmem:[%s3107_s28 + $0x170] sm:$0xff]  }
  0x25   : > { %2576 = vmatprep.subr.bf16.mxu1 %v2921_v28  ;;  %v2957_v28 = vld [vmem:[%s3107_s28 + $0x1f0] sm:$0xff]  }
  0x27   : > { %2537 = vmatpush3.bf16.msra.mxu0 %v2922_v29  ;;  %v2335_v29 = vcombine.high %v199_v20, %v207_v21  ;;  %v248_v20 = vld [vmem:[%s3499_s1 + $0x198] sm:$0xff] }
  0x28   : > { %2577 = vmatpush3.bf16.msra.mxu1 %v2923_v30  ;;  %2538 = vmatprep.subr.bf16.mxu0 %v2924_v31  ;;  %v2958_v30 = vld [vmem:[%s3107_s28 + $0x130] sm:$0xff]   ;;  %v256_v21 = vld [vmem:[%s3499_s1 + $0x1d8] sm:$0xff] }
  0x29   : > { %2578 = vmatprep.subr.bf16.mxu1 %v2925_v32  ;;  %v2959_v31 = vld [vmem:[%s3107_s28 + $0x1b0] sm:$0xff]   ;;  %v2960_v32 = vld [vmem:[%s3107_s28 + $0x178] sm:$0xff]  }
  0x2b   : > { %2539 = vmatpush3.bf16.msra.mxu0 %v2926_v33  ;;  %v2961_v33 = vld [vmem:[%s3107_s28 + $0x1f8] sm:$0xff]  }
  0x2c   : > { %2579 = vmatpush3.bf16.msra.mxu1 %v2927_v34  ;;  %2540 = vmatprep.subr.bf16.mxu0 %v2928_v35  ;;  %v2962_v34 = vld [vmem:[%s3107_s28 + $0x138] sm:$0xff]  }
  0x2d   : > { %2580 = vmatprep.subr.bf16.mxu1 %v2929_v38  ;;  %v2963_v35 = vld [vmem:[%s3107_s28 + $0x1b8] sm:$0xff]  }
  0x2e   : > { %v208_v38 = vld [vmem:[%s3499_s1 + $0x58] sm:$0xff] }
  0x2f   : > { %2541 = vmatpush3.bf16.msra.mxu0 %v2930_v41  ;;  %v2336_v39 = vcombine.low %v200_v37, %v208_v38  ;;  %v2337_v40 = vcombine.high %v200_v37, %v208_v38  ;;  %v2964_v41 = vld [vmem:[%s3107_s28 + $0x240] sm:$0xff]  }
  0x30   : > { %2581 = vmatpush3.bf16.msra.mxu1 %v2931_v42  ;;  %2606 = vmatprep.subr.bf16.mxu0 %v2932_v45  ;;  %v2965_v42 = vld [vmem:[%s3107_s28 + $0x2c0] sm:$0xff]   ;;  %v2968_v45 = vld [vmem:[%s3107_s28 + $0x248] sm:$0xff]  }
  0x31   : > { %2646 = vmatprep.subr.bf16.mxu1 %v2933_v46  ;;  %v2969_v46 = vld [vmem:[%s3107_s28 + $0x2c8] sm:$0xff]  }
  0x32   : > { %1687 = vmatmul.mubr.bf16.vlgmr.msra.gmra.mrb[0].mxu0 %v2330_v43  ;;  %v2966_v43 = vld [vmem:[%s3107_s28 + $0x200] sm:$0xff]  }
  0x33   : > { %1752 = vmatmul.mubr.bf16.vlgmr.msra.gmra.mrb[0].mxu1 %v2332_v44  ;;  %2607 = vmatpush3.bf16.msra.mxu0 %v2934_v48  ;;  %v2967_v44 = vld [vmem:[%s3107_s28 + $0x280] sm:$0xff]   ;;  %v2971_v48 = vld [vmem:[%s3107_s28 + $0x288] sm:$0xff]  }
  0x34   : > { %2647 = vmatpush3.bf16.msra.mxu1 %v2935_v50  ;;  %1694 = vmatprep.mubr.bf16.mxu0 %v2347_v47  ;;  %v2970_v47 = vld [vmem:[%s3107_s28 + $0x208] sm:$0xff]   ;;  %v223_v50 = vld [vmem:[%s3499_s1 + $0xd0] sm:$0xff] }
  0x35   : > { %2608 = vmatprep.subr.bf16.mxu0 %v2936_v51  ;;  %1759 = vmatprep.mubr.bf16.mxu1 %v2349_v49  ;;  %v215_v49 = vld [vmem:[%s3499_s1 + $0x90] sm:$0xff]  ;;  %v216_v51 = vld [vmem:[%s3499_s1 + $0x98] sm:$0xff] }
  0x36   : > { %2648 = vmatprep.subr.bf16.mxu1 %v2937_v54  ;;  %v2351_v53 = vcombine.high %v215_v49, %v223_v50  ;;  %v2353_v54 = vcombine.high %v216_v51, %v224_v52  ;;  %v2350_v55 = vcombine.low %v215_v49, %v223_v50  ;;  %v2352_v56 = vcombine.low %v216_v51, %v224_v52  ;;  %v217_v49 = vld [vmem:[%s3499_s1 + $0xa0] sm:$0xff]  ;;  %v218_v51 = vld [vmem:[%s3499_s1 + $0xa8] sm:$0xff] }
  0x37   : > { %2609 = vmatpush3.bf16.msra.mxu0 %v2938_v57  ;;  %v2972_v57 = vld [vmem:[%s3107_s28 + $0x250] sm:$0xff]   ;;  %v225_v50 = vld [vmem:[%s3499_s1 + $0xe0] sm:$0xff] }
  0x38   : > { %2649 = vmatpush3.bf16.msra.mxu1 %v2939_v58  ;;  %2610 = vmatprep.subr.bf16.mxu0 %v2940_v61  ;;  %v2973_v58 = vld [vmem:[%s3107_s28 + $0x2d0] sm:$0xff]   ;;  %v2976_v61 = vld [vmem:[%s3107_s28 + $0x258] sm:$0xff]   ;;  %v2355_v52 = vcombine.high %v217_v49, %v225_v50 }
  0x39   : > { %2650 = vmatprep.subr.bf16.mxu1 %v2941_v62  ;;  %v2977_v62 = vld [vmem:[%s3107_s28 + $0x2d8] sm:$0xff]  }
  0x3a   : > { %1695 = vmatmul.mubr.bf16.gmra.mrb[4].mxu0 %v2346_v59  ;;  %v2974_v59 = vld [vmem:[%s3107_s28 + $0x210] sm:$0xff]  }
  0x3b   : > { %1760 = vmatmul.mubr.bf16.gmra.mrb[4].mxu1 %v2348_v60  ;;  %2611 = vmatpush3.bf16.msra.mxu0 %v2942_v0  ;;  %v2975_v60 = vld [vmem:[%s3107_s28 + $0x290] sm:$0xff]   ;;  %v2979_v0 = vld [vmem:[%s3107_s28 + $0x298] sm:$0xff]  }
  0x3c   : > { %2651 = vmatpush3.bf16.msra.mxu1 %v2943_v2  ;;  %1702 = vmatprep.mubr.bf16.mxu0 %v2363_v63  ;;  %v2978_v63 = vld [vmem:[%s3107_s28 + $0x218] sm:$0xff]   ;;  %v239_v2 = vld [vmem:[%s3499_s1 + $0x150] sm:$0xff] }
  0x3d   : > { %2612 = vmatprep.subr.bf16.mxu0 %v2944_v3  ;;  %1767 = vmatprep.mubr.bf16.mxu1 %v2365_v1  ;;  %v231_v1 = vld [vmem:[%s3499_s1 + $0x110] sm:$0xff]  ;;  %v232_v3 = vld [vmem:[%s3499_s1 + $0x118] sm:$0xff] }
  0x3e   : > { %2652 = vmatprep.subr.bf16.mxu1 %v2945_v6  ;;  %v2367_v4 = vcombine.high %v231_v1, %v239_v2  ;;  %v2366_v6 = vcombine.low %v231_v1, %v239_v2  ;;  %v2369_v7 = vcombine.high %v232_v3, %v240_v5  ;;  %v2368_v8 = vcombine.low %v232_v3, %v240_v5  ;;  %v233_v1 = vld [vmem:[%s3499_s1 + $0x120] sm:$0xff]  ;;  %v242_v5 = vld [vmem:[%s3499_s1 + $0x168] sm:$0xff] }
  0x3f   : > { %2613 = vmatpush3.bf16.msra.mxu0 %v2946_v9  ;;  %v2980_v9 = vld [vmem:[%s3107_s28 + $0x260] sm:$0xff]  }
  0x40   : > { %2653 = vmatpush3.bf16.msra.mxu1 %v2947_v10  ;;  %2614 = vmatprep.subr.bf16.mxu0 %v2948_v13  ;;  %v2981_v10 = vld [vmem:[%s3107_s28 + $0x2e0] sm:$0xff]   ;;  %v2984_v13 = vld [vmem:[%s3107_s28 + $0x268] sm:$0xff]  }
  0x41   : > { %2654 = vmatprep.subr.bf16.mxu1 %v2949_v14  ;;  %v2985_v14 = vld [vmem:[%s3107_s28 + $0x2e8] sm:$0xff]   ;;  %v241_v2 = vld [vmem:[%s3499_s1 + $0x160] sm:$0xff] }
  0x42   : > { %1703 = vmatmul.mubr.bf16.gmra.mrb[8].mxu0 %v2362_v11  ;;  %v2982_v11 = vld [vmem:[%s3107_s28 + $0x220] sm:$0xff]   ;;  %v2371_v3 = vcombine.high %v233_v1, %v241_v2 }
  0x43   : > { %1768 = vmatmul.mubr.bf16.gmra.mrb[8].mxu1 %v2364_v12  ;;  %2615 = vmatpush3.bf16.msra.mxu0 %v2950_v16  ;;  %v2983_v12 = vld [vmem:[%s3107_s28 + $0x2a0] sm:$0xff]   ;;  %v2987_v16 = vld [vmem:[%s3107_s28 + $0x2a8] sm:$0xff]  }
  0x44   : > { %2655 = vmatpush3.bf16.msra.mxu1 %v2951_v18  ;;  %1710 = vmatprep.mubr.bf16.mxu0 %v2379_v15  ;;  %v2986_v15 = vld [vmem:[%s3107_s28 + $0x228] sm:$0xff]   ;;  %v255_v18 = vld [vmem:[%s3499_s1 + $0x1d0] sm:$0xff] }
  0x45   : > { %2616 = vmatprep.subr.bf16.mxu0 %v2952_v19  ;;  %1775 = vmatprep.mubr.bf16.mxu1 %v2381_v17  ;;  %v247_v17 = vld [vmem:[%s3499_s1 + $0x190] sm:$0xff] }
  0x46   : > { %2656 = vmatprep.subr.bf16.mxu1 %v2953_v22  ;;  %v2383_v19 = vcombine.high %v247_v17, %v255_v18  ;;  %v2382_v22 = vcombine.low %v247_v17, %v255_v18  ;;  %v3019_v17 = vld [vmem:[%s3107_s28 + $0x3a8] sm:$0xff]   ;;  %v249_v18 = vld [vmem:[%s3499_s1 + $0x1a0] sm:$0xff] }
  0x47   : > { %2617 = vmatpush3.bf16.msra.mxu0 %v2954_v23  ;;  %v2385_v23 = vcombine.high %v248_v20, %v256_v21 }
  0x48   : > { %2657 = vmatpush3.bf16.msra.mxu1 %v2955_v24  ;;  %2618 = vmatprep.subr.bf16.mxu0 %v2956_v27  ;;  %v2384_v24 = vcombine.low %v248_v20, %v256_v21  ;;  %v2990_v27 = vld [vmem:[%s3107_s28 + $0x230] sm:$0xff]   ;;  %v250_v20 = vld [vmem:[%s3499_s1 + $0x1a8] sm:$0xff] }
  0x49   : > { %2658 = vmatprep.subr.bf16.mxu1 %v2957_v28  ;;  %v2991_v28 = vld [vmem:[%s3107_s28 + $0x2b0] sm:$0xff]  }
  0x4a   : > { %1711 = vmatmul.mubr.bf16.gmra.mrb[12].mxu0 %v2378_v25  ;;  %v2988_v25 = vld [vmem:[%s3107_s28 + $0x270] sm:$0xff]  }
  0x4b   : > { %1776 = vmatmul.mubr.bf16.gmra.mrb[12].mxu1 %v2380_v26  ;;  %2619 = vmatpush3.bf16.msra.mxu0 %v2958_v30  ;;  %v2989_v26 = vld [vmem:[%s3107_s28 + $0x2f0] sm:$0xff]   ;;  %v2993_v30 = vld [vmem:[%s3107_s28 + $0x2f8] sm:$0xff]  }
  0x4c   : > { %2659 = vmatpush3.bf16.msra.mxu1 %v2959_v31  ;;  %1816 = vmatprep.mubr.bf16.mxu0 %v2335_v29  ;;  %v2992_v29 = vld [vmem:[%s3107_s28 + $0x278] sm:$0xff]  }
  0x4d   : > { %2620 = vmatprep.subr.bf16.mxu0 %v2960_v32  ;;  %2660 = vmatprep.subr.bf16.mxu1 %v2961_v33  ;;  %v2994_v31 = vld [vmem:[%s3107_s28 + $0x238] sm:$0xff]   ;;  %v201_v33 = vld [vmem:[%s3499_s1 + $0x20] sm:$0xff] }
  0x4e   : > { %1881 = vmatprep.mubr.bf16.mxu1 %v2337_v40  ;;  %v2995_v32 = vld [vmem:[%s3107_s28 + $0x2b8] sm:$0xff]  }
  0x4f   : > { %2621 = vmatpush3.bf16.msra.mxu0 %v2962_v34  ;;  %v209_v34 = vld [vmem:[%s3499_s1 + $0x60] sm:$0xff] }
  0x50   : > { %2661 = vmatpush3.bf16.msra.mxu1 %v2963_v35  ;;  %2686 = vmatprep.subr.bf16.mxu0 %v2964_v41  ;;  %v202_v35 = vld [vmem:[%s3499_s1 + $0x28] sm:$0xff]  ;;  %v2338_v37 = vcombine.low %v201_v33, %v209_v34  ;;  %v2339_v38 = vcombine.high %v201_v33, %v209_v34  ;;  %v2996_v41 = vld [vmem:[%s3107_s28 + $0x340] sm:$0xff]   ;;  %v263_v33 = vld [vmem:[%s3500_s2 + $0x10] sm:$0xff] }
  0x51   : > { %2726 = vmatprep.subr.bf16.mxu1 %v2965_v42  ;;  %v2997_v42 = vld [vmem:[%s3107_s28 + $0x3c0] sm:$0xff]   ;;  %538 = vperm.xlu1 %2899, %v263_v33   ;;  %v3026_v34 = vld [vmem:[%s3107_s28 + $0x338] sm:$0xff]  }
  0x52   : > { %1817 = vmatmul.mubr.bf16.vlgmr.msra.gmra.mrb[16].mxu0 %v2334_v36  ;;  %v210_v36 = vld [vmem:[%s3499_s1 + $0x68] sm:$0xff] }
  0x53   : > { %1882 = vmatmul.mubr.bf16.vlgmr.msra.gmra.mrb[16].mxu1 %v2336_v39  ;;  %2687 = vmatpush3.bf16.msra.mxu0 %v2966_v43  ;;  %v2340_v39 = vcombine.low %v202_v35, %v210_v36  ;;  %v2341_v40 = vcombine.high %v202_v35, %v210_v36  ;;  %v2998_v43 = vld [vmem:[%s3107_s28 + $0x300] sm:$0xff]   ;;  %v3027_v35 = vld [vmem:[%s3107_s28 + $0x3b8] sm:$0xff]   ;;  %v203_v36 = vld [vmem:[%s3499_s1 + $0x30] sm:$0xff] }
  0x54   : > { %2727 = vmatpush3.bf16.msra.mxu1 %v2967_v44  ;;  %2688 = vmatprep.subr.bf16.mxu0 %v2968_v45  ;;  %v2999_v44 = vld [vmem:[%s3107_s28 + $0x380] sm:$0xff]   ;;  %v3000_v45 = vld [vmem:[%s3107_s28 + $0x348] sm:$0xff]  }
  0x55   : > { %2728 = vmatprep.subr.bf16.mxu1 %v2969_v46  ;;  %1824 = vmatprep.mubr.bf16.mxu0 %v2351_v53  ;;  %v3001_v46 = vld [vmem:[%s3107_s28 + $0x3c8] sm:$0xff]  }
  0x56   : > { %1889 = vmatprep.mubr.bf16.mxu1 %v2353_v54  ;;  %v226_v53 = vld [vmem:[%s3499_s1 + $0xe8] sm:$0xff]  ;;  %v2354_v54 = vcombine.low %v217_v49, %v225_v50  ;;  %v228_v50 = vld [vmem:[%s3499_s1 + $0xf8] sm:$0xff] }
  0x57   : > { %2689 = vmatpush3.bf16.msra.mxu0 %v2970_v47  ;;  %v3002_v47 = vld [vmem:[%s3107_s28 + $0x308] sm:$0xff]  }
  0x58   : > { %2729 = vmatpush3.bf16.msra.mxu1 %v2971_v48  ;;  %2690 = vmatprep.subr.bf16.mxu0 %v2972_v57  ;;  %v3003_v48 = vld [vmem:[%s3107_s28 + $0x388] sm:$0xff]   ;;  %v3004_v57 = vld [vmem:[%s3107_s28 + $0x350] sm:$0xff]  }
  0x59   : > { %2730 = vmatprep.subr.bf16.mxu1 %v2973_v58  ;;  %v3005_v58 = vld [vmem:[%s3107_s28 + $0x3d0] sm:$0xff]  }
  0x5a   : > { %1825 = vmatmul.mubr.bf16.gmra.mrb[20].mxu0 %v2350_v55  ;;  %v2357_v55 = vcombine.high %v218_v51, %v226_v53 }
  0x5b   : > { %1890 = vmatmul.mubr.bf16.gmra.mrb[20].mxu1 %v2352_v56  ;;  %2691 = vmatpush3.bf16.msra.mxu0 %v2974_v59  ;;  %v2356_v56 = vcombine.low %v218_v51, %v226_v53  ;;  %v3006_v59 = vld [vmem:[%s3107_s28 + $0x310] sm:$0xff]   ;;  %v266_v51 = vld [vmem:[%s3500_s2 + $0x28] sm:$0xff] }
  0x5c   : > { %2731 = vmatpush3.bf16.msra.mxu1 %v2975_v60  ;;  %2692 = vmatprep.subr.bf16.mxu0 %v2976_v61  ;;  %v3007_v60 = vld [vmem:[%s3107_s28 + $0x390] sm:$0xff]   ;;  %v3008_v61 = vld [vmem:[%s3107_s28 + $0x358] sm:$0xff]  }
  0x5d   : > { %2732 = vmatprep.subr.bf16.mxu1 %v2977_v62  ;;  %1832 = vmatprep.mubr.bf16.mxu0 %v2367_v4  ;;  %v3009_v62 = vld [vmem:[%s3107_s28 + $0x3d8] sm:$0xff]   ;;  %v234_v4 = vld [vmem:[%s3499_s1 + $0x128] sm:$0xff]  ;;  %v267_v53 = vld [vmem:[%s3500_s2 + $0x30] sm:$0xff] }
  0x5e   : > { %1897 = vmatprep.mubr.bf16.mxu1 %v2369_v7  ;;  %v2373_v7 = vcombine.high %v234_v4, %v242_v5 }
  0x5f   : > { %2693 = vmatpush3.bf16.msra.mxu0 %v2978_v63  ;;  %v3010_v63 = vld [vmem:[%s3107_s28 + $0x318] sm:$0xff]  }
  0x60   : > { %2733 = vmatpush3.bf16.msra.mxu1 %v2979_v0  ;;  %2694 = vmatprep.subr.bf16.mxu0 %v2980_v9  ;;  %v3011_v0 = vld [vmem:[%s3107_s28 + $0x398] sm:$0xff]   ;;  %v3012_v9 = vld [vmem:[%s3107_s28 + $0x360] sm:$0xff]  }
  0x61   : > { %2734 = vmatprep.subr.bf16.mxu1 %v2981_v10  ;;  %v3013_v10 = vld [vmem:[%s3107_s28 + $0x3e0] sm:$0xff]  }
  0x62   : > { %1833 = vmatmul.mubr.bf16.gmra.mrb[24].mxu0 %v2366_v6  ;;  %v2370_v6 = vcombine.low %v233_v1, %v241_v2  ;;  %v252_v1 = vld [vmem:[%s3499_s1 + $0x1b8] sm:$0xff] }
  0x63   : > { %1898 = vmatmul.mubr.bf16.gmra.mrb[24].mxu1 %v2368_v8  ;;  %2695 = vmatpush3.bf16.msra.mxu0 %v2982_v11  ;;  %v2372_v8 = vcombine.low %v234_v4, %v242_v5  ;;  %v3014_v11 = vld [vmem:[%s3107_s28 + $0x320] sm:$0xff]   ;;  %v260_v2 = vld [vmem:[%s3499_s1 + $0x1f8] sm:$0xff] }
  0x64   : > { %2735 = vmatpush3.bf16.msra.mxu1 %v2983_v12  ;;  %2696 = vmatprep.subr.bf16.mxu0 %v2984_v13  ;;  %v3015_v12 = vld [vmem:[%s3107_s28 + $0x3a0] sm:$0xff]   ;;  %v3016_v13 = vld [vmem:[%s3107_s28 + $0x368] sm:$0xff]  }
  0x65   : > { %2736 = vmatprep.subr.bf16.mxu1 %v2985_v14  ;;  %1840 = vmatprep.mubr.bf16.mxu0 %v2383_v19  ;;  %v3017_v14 = vld [vmem:[%s3107_s28 + $0x3e8] sm:$0xff]   ;;  %v257_v19 = vld [vmem:[%s3499_s1 + $0x1e0] sm:$0xff] }
  0x66   : > { %1905 = vmatprep.mubr.bf16.mxu1 %v2385_v23  ;;  %v2387_v21 = vcombine.high %v249_v18, %v257_v19  ;;  %v2386_v23 = vcombine.low %v249_v18, %v257_v19 }
  0x67   : > { %2697 = vmatpush3.bf16.msra.mxu0 %v2986_v15  ;;  %v261_v15 = vld [vmem:[%s3500_s2] sm:$0xff] }
  0x68   : > { %2737 = vmatpush3.bf16.msra.mxu1 %v2987_v16  ;;  %2698 = vmatprep.subr.bf16.mxu0 %v2988_v25  ;;  %v3018_v16 = vld [vmem:[%s3107_s28 + $0x328] sm:$0xff]  }
  0x69   : > { %2738 = vmatprep.subr.bf16.mxu1 %v2989_v26  ;;  %528 = vperm.xlu0 %2898, %v261_v15   ;;  %v3020_v26 = vld [vmem:[%s3107_s28 + $0x370] sm:$0xff]  }
  0x6a   : > { %1841 = vmatmul.mubr.bf16.gmra.mrb[28].mxu0 %v2382_v22  ;;  %v258_v22 = vld [vmem:[%s3499_s1 + $0x1e8] sm:$0xff] }
  0x6b   : > { %1906 = vmatmul.mubr.bf16.gmra.mrb[28].mxu1 %v2384_v24  ;;  %2699 = vmatpush3.bf16.msra.mxu0 %v2990_v27  ;;  %v2389_v24 = vcombine.high %v250_v20, %v258_v22  ;;  %v2388_v25 = vcombine.low %v250_v20, %v258_v22  ;;  %v3021_v27 = vld [vmem:[%s3107_s28 + $0x3f0] sm:$0xff]  }
  0x6c   : > { %2739 = vmatpush3.bf16.msra.mxu1 %v2991_v28  ;;  %2700 = vmatprep.subr.bf16.mxu0 %v2992_v29  ;;  %v262_v28 = vld [vmem:[%s3500_s2 + $0x8] sm:$0xff]  ;;  %v3022_v29 = vld [vmem:[%s3107_s28 + $0x330] sm:$0xff]  }
  0x6d   : > { %2740 = vmatprep.subr.bf16.mxu1 %v2993_v30  ;;  %1946 = vmatprep.mubr.bf16.mxu0 %v2339_v38  ;;  %v3023_v30 = vld [vmem:[%s3107_s28 + $0x3b0] sm:$0xff]   ;;  %v204_v38 = vld [vmem:[%s3499_s1 + $0x38] sm:$0xff] }
  0x6e   : > { %2011 = vmatprep.mubr.bf16.mxu1 %v2341_v40  ;;  %533 = vperm.xlu0 %2898, %v262_v28  }
  0x6f   : > { %2701 = vmatpush3.bf16.msra.mxu0 %v2994_v31  ;;  %v3024_v31 = vld [vmem:[%s3107_s28 + $0x378] sm:$0xff]  }
  0x70   : > { %2741 = vmatpush3.bf16.msra.mxu1 %v2995_v32  ;;  %2766 = vmatprep.subr.bf16.mxu0 %v2996_v41  ;;  %v3025_v32 = vld [vmem:[%s3107_s28 + $0x3f8] sm:$0xff]  }
  0x71   : > { %2806 = vmatprep.subr.bf16.mxu1 %v2997_v42  ;;  %v212_v41 = vld [vmem:[%s3499_s1 + $0x78] sm:$0xff] }
  0x72   : > { %1947 = vmatmul.mubr.bf16.vlgmr.msra.gmra.mrb[32].mxu0 %v2338_v37  ;;  %v211_v37 = vld [vmem:[%s3499_s1 + $0x70] sm:$0xff]  ;;  %v264_v42 = vld [vmem:[%s3500_s2 + $0x18] sm:$0xff] }
  0x73   : > { %2012 = vmatmul.mubr.bf16.vlgmr.msra.gmra.mrb[32].mxu1 %v2340_v39  ;;  %2767 = vmatpush3.bf16.msra.mxu0 %v2998_v43  ;;  %v2342_v39 = vcombine.low %v203_v36, %v211_v37  ;;  %v2343_v40 = vcombine.high %v203_v36, %v211_v37  ;;  %v265_v43 = vld [vmem:[%s3500_s2 + $0x20] sm:$0xff] }
  0x74   : > { %2807 = vmatpush3.bf16.msra.mxu1 %v2999_v44  ;;  %2768 = vmatprep.subr.bf16.mxu0 %v3000_v45  ;;  %v2344_v44 = vcombine.low %v204_v38, %v212_v41  ;;  %v2345_v45 = vcombine.high %v204_v38, %v212_v41 }
  0x75   : > { %2808 = vmatprep.subr.bf16.mxu1 %v3001_v46  ;;  %1954 = vmatprep.mubr.bf16.mxu0 %v2355_v52  ;;  %v219_v46 = vld [vmem:[%s3499_s1 + $0xb0] sm:$0xff] }
  0x76   : > { %2019 = vmatprep.mubr.bf16.mxu1 %v2357_v55  ;;  %543 = vperm.xlu1 %2899, %v264_v42   ;;  %v243_v55 = vld [vmem:[%s3499_s1 + $0x170] sm:$0xff] }
  0x77   : > { %2769 = vmatpush3.bf16.msra.mxu0 %v3002_v47  ;;  %548 = vperm.xlu0 %2898, %v265_v43   ;;  %v227_v47 = vld [vmem:[%s3499_s1 + $0xf0] sm:$0xff] }
  0x78   : > { %2809 = vmatpush3.bf16.msra.mxu1 %v3003_v48  ;;  %2770 = vmatprep.subr.bf16.mxu0 %v3004_v57  ;;  %v220_v48 = vld [vmem:[%s3499_s1 + $0xb8] sm:$0xff]  ;;  %v2359_v49 = vcombine.high %v219_v46, %v227_v47 }
  0x79   : > { %2810 = vmatprep.subr.bf16.mxu1 %v3005_v58  ;;  %v2361_v52 = vcombine.high %v220_v48, %v228_v50  ;;  %v244_v57 = vld [vmem:[%s3499_s1 + $0x178] sm:$0xff] }
  0x7a   : > { %1955 = vmatmul.mubr.bf16.gmra.mrb[36].mxu0 %v2354_v54  ;;  %553 = vperm.xlu1 %2899, %v266_v51   ;;  %v235_v54 = vld [vmem:[%s3499_s1 + $0x130] sm:$0xff]  ;;  %v268_v58 = vld [vmem:[%s3500_s2 + $0x38] sm:$0xff] }
  0x7b   : > { %2020 = vmatmul.mubr.bf16.gmra.mrb[36].mxu1 %v2356_v56  ;;  %2771 = vmatpush3.bf16.msra.mxu0 %v3006_v59  ;;  %v236_v56 = vld [vmem:[%s3499_s1 + $0x138] sm:$0xff]  ;;  %v2358_v59 = vcombine.low %v219_v46, %v227_v47 }
  0x7c   : > { %2811 = vmatpush3.bf16.msra.mxu1 %v3007_v60  ;;  %2772 = vmatprep.subr.bf16.mxu0 %v3008_v61  ;;  %v2360_v60 = vcombine.low %v220_v48, %v228_v50  ;;  %v2375_v61 = vcombine.high %v235_v54, %v243_v55  ;;  %v2376_v4 = vcombine.low %v236_v56, %v244_v57  ;;  %v3043_v50 = vmov 0.0  }
  0x7d   : > { %2812 = vmatprep.subr.bf16.mxu1 %v3009_v62  ;;  %1962 = vmatprep.mubr.bf16.mxu0 %v2371_v3  ;;  %v2377_v62 = vcombine.high %v236_v56, %v244_v57  ;;  %v2374_v3 = vcombine.low %v235_v54, %v243_v55 }
  0x7e   : > { %2027 = vmatprep.mubr.bf16.mxu1 %v2373_v7  ;;  %558 = vperm.xlu0 %2898, %v267_v53  }
  0x7f   : > { %2773 = vmatpush3.bf16.msra.mxu0 %v3010_v63  ;;  %563 = vperm.xlu1 %2899, %v268_v58   ;;  %v251_v63 = vld [vmem:[%s3499_s1 + $0x1b0] sm:$0xff] }
  0x80   : > { %2813 = vmatpush3.bf16.msra.mxu1 %v3011_v0  ;;  %2774 = vmatprep.subr.bf16.mxu0 %v3012_v9  ;;  %v259_v0 = vld [vmem:[%s3499_s1 + $0x1f0] sm:$0xff]  ;;  %v3041_v9 = vmov 0.0|0.0  }
  0x81   : > { %2814 = vmatprep.subr.bf16.mxu1 %v3013_v10  ;;  %v2391_v5 = vcombine.high %v251_v63, %v259_v0  ;;  %v2390_v7 = vcombine.low %v251_v63, %v259_v0 }
  0x82   : > { %1963 = vmatmul.mubr.bf16.gmra.mrb[40].mxu0 %v2370_v6  ;;  %v2393_v6 = vcombine.high %v252_v1, %v260_v2 }
  0x83   : > { %2028 = vmatmul.mubr.bf16.gmra.mrb[40].mxu1 %v2372_v8  ;;  %2775 = vmatpush3.bf16.msra.mxu0 %v3014_v11  ;;  %v2392_v8 = vcombine.low %v252_v1, %v260_v2 }
  0x84   : > { %2815 = vmatpush3.bf16.msra.mxu1 %v3015_v12  ;;  %2776 = vmatprep.subr.bf16.mxu0 %v3016_v13 }
  0x85   : > { %2816 = vmatprep.subr.bf16.mxu1 %v3017_v14  ;;  %1970 = vmatprep.mubr.bf16.mxu0 %v2387_v21 }
  0x86   : > { %2035 = vmatprep.mubr.bf16.mxu1 %v2389_v24 }
  0x87   : > { %2777 = vmatpush3.bf16.msra.mxu0 %v3018_v16 }
  0x88   : > { %2817 = vmatpush3.bf16.msra.mxu1 %v3019_v17  ;;  %2778 = vmatprep.subr.bf16.mxu0 %v3020_v26 }
  0x89   : > { %2818 = vmatprep.subr.bf16.mxu1 %v3021_v27 }
  0x8a   : > { %1971 = vmatmul.mubr.bf16.gmra.mrb[44].mxu0 %v2386_v23 }
  0x8b   : > { %2036 = vmatmul.mubr.bf16.gmra.mrb[44].mxu1 %v2388_v25  ;;  %2779 = vmatpush3.bf16.msra.mxu0 %v3022_v29 }
  0x8c   : > { %2819 = vmatpush3.bf16.msra.mxu1 %v3023_v30  ;;  %2780 = vmatprep.subr.bf16.mxu0 %v3024_v31 }
  0x8d   : > { %2820 = vmatprep.subr.bf16.mxu1 %v3025_v32  ;;  %2076 = vmatprep.mubr.bf16.mxu0 %v2343_v40 }
  0x8e   : > { %2141 = vmatprep.mubr.bf16.mxu1 %v2345_v45 }
  0x8f   : > { %2781 = vmatpush3.bf16.msra.mxu0 %v3026_v34 }
  0x90   : > { %2821 = vmatpush3.bf16.msra.mxu1 %v3027_v35  ;;  %2874 = vmatprep.subr.bf16.mxu0 %v3041_v9 }
  0x92   : > { %2077 = vmatmul.mubr.bf16.vlgmr.msra.gmra.mrb[48].mxu0 %v2342_v39 }
  0x93   : > { %2142 = vmatmul.mubr.bf16.vlgmr.msra.gmra.mrb[48].mxu1 %v2344_v44  ;;  %2084 = vmatprep.mubr.bf16.mxu0 %v2359_v49 }
  0x94   : > { %2149 = vmatprep.mubr.bf16.mxu1 %v2361_v52 }
  0x9a   : > { %2085 = vmatmul.mubr.bf16.gmra.mrb[52].mxu0 %v2358_v59 }
  0x9b   : > { %2150 = vmatmul.mubr.bf16.gmra.mrb[52].mxu1 %v2360_v60  ;;  %2092 = vmatprep.mubr.bf16.mxu0 %v2375_v61 }
  0x9c   : > { %2157 = vmatprep.mubr.bf16.mxu1 %v2377_v62 }
  0xa2   : > { %2093 = vmatmul.mubr.bf16.gmra.mrb[56].mxu0 %v2374_v3 }
  0xa3   : > { %2158 = vmatmul.mubr.bf16.gmra.mrb[56].mxu1 %v2376_v4  ;;  %2100 = vmatprep.mubr.bf16.mxu0 %v2391_v5 }
  0xa4   : > { %2165 = vmatprep.mubr.bf16.mxu1 %v2393_v6 }
  0xaa   : > { %2101 = vmatmul.mubr.bf16.gmra.mrb[60].mxu0 %v2390_v7 }
  0xab   : > { %2166 = vmatmul.mubr.bf16.gmra.mrb[60].mxu1 %v2392_v8  ;;  %2871 = vmatprep.mubr.msk.f32.mxu0 %vm3042_vm0, %v3043_v50 }
  0xd0   : > { %v539_v42 = vpop.permute.xlu1 %538 }
  0xe8   : > { %v529_v22 = vpop.permute.xlu0 %528 }
  0xed   : > { %v534_v37 = vpop.permute.xlu0 %533 }
  0xf5   : > { %v544_v56 = vpop.permute.xlu1 %543 }
  0xf6   : > { %v549_v57 = vpop.permute.xlu0 %548 }
  0xf9   : > { %v554_v1 = vpop.permute.xlu1 %553 }
  0xfd   : > { %v559_v8 = vpop.permute.xlu0 %558 }
 0x105   : > { %v2542_v10 = vpop.f32.mrb[0].mxu0 }
 0x106   : > { %v2582_v11 = vpop.f32.mrb[0].mxu1  ;;  %v2543_v12 = vpop.f32.mrb[1].mxu0 }
 0x107   : > { %v2544_v13 = vadd.f32 %v2543_v12, %v2542_v10  ;;  %v2583_v14 = vpop.f32.mrb[1].mxu1  ;;  %v2545_v15 = vpop.f32.mrb[2].mxu0 }
 0x108   : > { %v2584_v16 = vadd.f32 %v2583_v14, %v2582_v11  ;;  %v2585_v17 = vpop.f32.mrb[2].mxu1  ;;  %v2546_v18 = vpop.f32.mrb[3].mxu0 }
 0x109   : > { %v2547_v19 = vadd.f32 %v2546_v18, %v2545_v15  ;;  %v2586_v20 = vpop.f32.mrb[3].mxu1  ;;  %v1689_v24 = vadd.f32 %v2544_v13, %v529_v22 }
 0x10a   : > { %v2587_v21 = vadd.f32 %v2586_v20, %v2585_v17 }
 0x10b   : > { %v3446_v30 = vadd.f32 %v2584_v16, %v1689_v24  ;;  %v1692_v39 = vadd.f32 %v2547_v19, %v534_v37  ;;  %v564_v16 = vpop.permute.xlu1 %563 }
 0x10d   : > { %v2548_v23 = vpop.f32.mrb[4].mxu0  ;;  %v1757_v45 = vadd.f32 %v2587_v21, %v1692_v39 }
 0x10e   : > { %v2588_v25 = vpop.f32.mrb[4].mxu1  ;;  %v2549_v26 = vpop.f32.mrb[5].mxu0 }
 0x10f   : > { %v2550_v27 = vadd.f32 %v2549_v26, %v2548_v23  ;;  %v2589_v28 = vpop.f32.mrb[5].mxu1  ;;  %v2551_v29 = vpop.f32.mrb[6].mxu0 }
 0x110   : > { %v2590_v31 = vadd.f32 %v2589_v28, %v2588_v25  ;;  %v2591_v32 = vpop.f32.mrb[6].mxu1  ;;  %v2552_v33 = vpop.f32.mrb[7].mxu0 }
 0x111   : > { %v2553_v34 = vadd.f32 %v2552_v33, %v2551_v29  ;;  %v2592_v35 = vpop.f32.mrb[7].mxu1  ;;  %v1697_v46 = vadd.f32 %v2550_v27, %v539_v42 }
 0x112   : > { %v2593_v36 = vadd.f32 %v2592_v35, %v2591_v32 }
 0x113   : > { %v1762_v53 = vadd.f32 %v2590_v31, %v1697_v46  ;;  %v1700_v58 = vadd.f32 %v2553_v34, %v544_v56 }
 0x115   : > { %v2554_v38 = vpop.f32.mrb[8].mxu0  ;;  %v1765_v61 = vadd.f32 %v2593_v36, %v1700_v58 }
 0x116   : > { %v2594_v40 = vpop.f32.mrb[8].mxu1  ;;  %v2555_v41 = vpop.f32.mrb[9].mxu0 }
 0x117   : > { %v2556_v43 = vadd.f32 %v2555_v41, %v2554_v38  ;;  %v2595_v44 = vpop.f32.mrb[9].mxu1  ;;  %v2557_v48 = vpop.f32.mrb[10].mxu0 }
 0x118   : > { %v2596_v47 = vadd.f32 %v2595_v44, %v2594_v40  ;;  %v2597_v49 = vpop.f32.mrb[10].mxu1  ;;  %v2558_v51 = vpop.f32.mrb[11].mxu0 }
 0x119   : > { %v2598_v52 = vpop.f32.mrb[11].mxu1  ;;  %v2559_v54 = vadd.f32 %v2558_v51, %v2557_v48  ;;  %v1705_v59 = vadd.f32 %v2556_v43, %v549_v57 }
 0x11a   : > { %v2599_v55 = vadd.f32 %v2598_v52, %v2597_v49 }
 0x11b   : > { %v1770_v62 = vadd.f32 %v2596_v47, %v1705_v59  ;;  %v1708_v4 = vadd.f32 %v2559_v54, %v554_v1 }
 0x11d   : > { %v2560_v60 = vpop.f32.mrb[12].mxu0  ;;  %v1773_v11 = vadd.f32 %v2599_v55, %v1708_v4 }
 0x11e   : > { %v2600_v63 = vpop.f32.mrb[12].mxu1  ;;  %v2561_v0 = vpop.f32.mrb[13].mxu0 }
 0x11f   : > { %v2562_v2 = vadd.f32 %v2561_v0, %v2560_v60  ;;  %v2601_v3 = vpop.f32.mrb[13].mxu1  ;;  %v2563_v6 = vpop.f32.mrb[14].mxu0 }
 0x120   : > { %v2602_v5 = vadd.f32 %v2601_v3, %v2600_v63  ;;  %v2603_v7 = vpop.f32.mrb[14].mxu1  ;;  %v2564_v10 = vpop.f32.mrb[15].mxu0 }
 0x121   : > { %v1713_v12 = vadd.f32 %v2562_v2, %v559_v8  ;;  %v2565_v13 = vadd.f32 %v2564_v10, %v2563_v6  ;;  %v2604_v14 = vpop.f32.mrb[15].mxu1 }
 0x122   : > { %v2605_v15 = vadd.f32 %v2604_v14, %v2603_v7 }
 0x123   : > { %v1778_v17 = vadd.f32 %v2602_v5, %v1713_v12  ;;  %v1716_v18 = vadd.f32 %v2565_v13, %v564_v16 }
 0x125   : > { %v2622_v19 = vpop.f32.mrb[16].mxu0  ;;  %v1781_v20 = vadd.f32 %v2605_v15, %v1716_v18 }
 0x126   : > { %v2662_v21 = vpop.f32.mrb[16].mxu1  ;;  %v2623_v22 = vpop.f32.mrb[17].mxu0 }
 0x127   : > { %v2624_v23 = vadd.f32 %v2623_v22, %v2622_v19  ;;  %v2663_v24 = vpop.f32.mrb[17].mxu1  ;;  %v2625_v25 = vpop.f32.mrb[18].mxu0 }
 0x128   : > { %v2664_v26 = vadd.f32 %v2663_v24, %v2662_v21  ;;  %v2665_v27 = vpop.f32.mrb[18].mxu1  ;;  %v2626_v28 = vpop.f32.mrb[19].mxu0 }
 0x129   : > { %v1819_v29 = vadd.f32 %v2624_v23, %v3446_v30  ;;  %v2627_v31 = vadd.f32 %v2626_v28, %v2625_v25  ;;  %v2666_v32 = vpop.f32.mrb[19].mxu1 }
 0x12a   : > { %v2667_v33 = vadd.f32 %v2666_v32, %v2665_v27 }
 0x12b   : > { %v1884_v34 = vadd.f32 %v2664_v26, %v1819_v29  ;;  %v1822_v35 = vadd.f32 %v2627_v31, %v1757_v45 }
 0x12d   : > { %v3449_v36 = vadd.f32 %v2667_v33, %v1822_v35  ;;  %v2628_v37 = vpop.f32.mrb[20].mxu0 }
 0x12e   : > { %v2668_v38 = vpop.f32.mrb[20].mxu1  ;;  %v2629_v39 = vpop.f32.mrb[21].mxu0 }
 0x12f   : > { %v2669_v40 = vpop.f32.mrb[21].mxu1  ;;  %v2630_v41 = vadd.f32 %v2629_v39, %v2628_v37  ;;  %v2631_v43 = vpop.f32.mrb[22].mxu0 }
 0x130   : > { %v2670_v42 = vadd.f32 %v2669_v40, %v2668_v38  ;;  %v2671_v44 = vpop.f32.mrb[22].mxu1  ;;  %v2632_v46 = vpop.f32.mrb[23].mxu0 }
 0x131   : > { %v2672_v47 = vpop.f32.mrb[23].mxu1  ;;  %v1827_v48 = vadd.f32 %v2630_v41, %v1762_v53  ;;  %v2633_v49 = vadd.f32 %v2632_v46, %v2631_v43 }
 0x132   : > { %v2673_v30 = vadd.f32 %v2672_v47, %v2671_v44 }
 0x133   : > { %v1892_v50 = vadd.f32 %v2670_v42, %v1827_v48  ;;  %v1830_v51 = vadd.f32 %v2633_v49, %v1765_v61 }
 0x135   : > { %v3451_v52 = vadd.f32 %v2673_v30, %v1830_v51  ;;  %v2634_v45 = vpop.f32.mrb[24].mxu0 }
 0x136   : > { %v2674_v54 = vpop.f32.mrb[24].mxu1  ;;  %v2635_v55 = vpop.f32.mrb[25].mxu0 }
 0x137   : > { %v2636_v56 = vadd.f32 %v2635_v55, %v2634_v45  ;;  %v2675_v57 = vpop.f32.mrb[25].mxu1  ;;  %v2637_v58 = vpop.f32.mrb[26].mxu0 }
 0x138   : > { %v2676_v59 = vadd.f32 %v2675_v57, %v2674_v54  ;;  %v2677_v60 = vpop.f32.mrb[26].mxu1  ;;  %v2638_v63 = vpop.f32.mrb[27].mxu0 }
 0x139   : > { %v1835_v0 = vadd.f32 %v2636_v56, %v1770_v62  ;;  %v2639_v1 = vadd.f32 %v2638_v63, %v2637_v58  ;;  %v2678_v2 = vpop.f32.mrb[27].mxu1 }
 0x13a   : > { %v2679_v3 = vadd.f32 %v2678_v2, %v2677_v60 }
 0x13b   : > { %v1900_v53 = vadd.f32 %v2676_v59, %v1835_v0  ;;  %v1838_v4 = vadd.f32 %v2639_v1, %v1773_v11 }
 0x13d   : > { %v3453_v5 = vadd.f32 %v2679_v3, %v1838_v4  ;;  %v2640_v61 = vpop.f32.mrb[28].mxu0 }
 0x13e   : > { %v2680_v6 = vpop.f32.mrb[28].mxu1  ;;  %v2641_v7 = vpop.f32.mrb[29].mxu0 }
 0x13f   : > { %v2642_v8 = vadd.f32 %v2641_v7, %v2640_v61  ;;  %v2681_v10 = vpop.f32.mrb[29].mxu1  ;;  %v2643_v12 = vpop.f32.mrb[30].mxu0 }
 0x140   : > { %v2682_v13 = vadd.f32 %v2681_v10, %v2680_v6  ;;  %v2683_v14 = vpop.f32.mrb[30].mxu1  ;;  %v2644_v15 = vpop.f32.mrb[31].mxu0 }
 0x141   : > { %v1843_v16 = vadd.f32 %v2642_v8, %v1778_v17  ;;  %v2645_v18 = vadd.f32 %v2644_v15, %v2643_v12  ;;  %v2684_v19 = vpop.f32.mrb[31].mxu1 }
 0x142   : > { %v2685_v62 = vadd.f32 %v2684_v19, %v2683_v14 }
 0x143   : > { %v1908_v21 = vadd.f32 %v2682_v13, %v1843_v16  ;;  %v1846_v22 = vadd.f32 %v2645_v18, %v1781_v20 }
 0x145   : > { %v3455_v23 = vadd.f32 %v2685_v62, %v1846_v22  ;;  %v2702_v11 = vpop.f32.mrb[32].mxu0 }
 0x146   : > { %v2742_v24 = vpop.f32.mrb[32].mxu1  ;;  %v2703_v25 = vpop.f32.mrb[33].mxu0 }
 0x147   : > { %v2743_v26 = vpop.f32.mrb[33].mxu1  ;;  %v2704_v27 = vadd.f32 %v2703_v25, %v2702_v11  ;;  %v2705_v29 = vpop.f32.mrb[34].mxu0 }
 0x148   : > { %v2744_v28 = vadd.f32 %v2743_v26, %v2742_v24  ;;  %v2745_v31 = vpop.f32.mrb[34].mxu1  ;;  %v2706_v32 = vpop.f32.mrb[35].mxu0 }
 0x149   : > { %v2746_v33 = vpop.f32.mrb[35].mxu1  ;;  %v1949_v35 = vadd.f32 %v2704_v27, %v1884_v34  ;;  %v2707_v37 = vadd.f32 %v2706_v32, %v2705_v29 }
 0x14a   : > { %v2747_v17 = vadd.f32 %v2746_v33, %v2745_v31 }
 0x14b   : > { %v2014_v38 = vadd.f32 %v2744_v28, %v1949_v35  ;;  %v1952_v39 = vadd.f32 %v2707_v37, %v3449_v36 }
 0x14d   : > { %v3458_v40 = vadd.f32 %v2747_v17, %v1952_v39  ;;  %v2708_v20 = vpop.f32.mrb[36].mxu0 }
 0x14e   : > { %v2748_v41 = vpop.f32.mrb[36].mxu1  ;;  %v2709_v42 = vpop.f32.mrb[37].mxu0 }
 0x14f   : > { %v2710_v43 = vadd.f32 %v2709_v42, %v2708_v20  ;;  %v2749_v44 = vpop.f32.mrb[37].mxu1  ;;  %v2711_v46 = vpop.f32.mrb[38].mxu0 }
 0x150   : > { %v2750_v47 = vadd.f32 %v2749_v44, %v2748_v41  ;;  %v2751_v48 = vpop.f32.mrb[38].mxu1  ;;  %v2712_v49 = vpop.f32.mrb[39].mxu0 }
 0x151   : > { %v1957_v30 = vadd.f32 %v2710_v43, %v1892_v50  ;;  %v2713_v51 = vadd.f32 %v2712_v49, %v2711_v46  ;;  %v2752_v45 = vpop.f32.mrb[39].mxu1 }
 0x152   : > { %v2753_v34 = vadd.f32 %v2752_v45, %v2751_v48 }
 0x153   : > { %v3460_v54 = vadd.f32 %v2750_v47, %v1957_v30  ;;  %v1960_v55 = vadd.f32 %v2713_v51, %v3451_v52 }
 0x155   : > { %v3463_v36 = vadd.f32 %v2753_v34, %v1960_v55  ;;  %v2714_v56 = vpop.f32.mrb[40].mxu0 }
 0x156   : > { %v2754_v57 = vpop.f32.mrb[40].mxu1  ;;  %v2715_v58 = vpop.f32.mrb[41].mxu0 }
 0x157   : > { %v2716_v59 = vadd.f32 %v2715_v58, %v2714_v56  ;;  %v2755_v60 = vpop.f32.mrb[41].mxu1  ;;  %v2717_v63 = vpop.f32.mrb[42].mxu0 }
 0x158   : > { %v2756_v0 = vadd.f32 %v2755_v60, %v2754_v57  ;;  %v2757_v1 = vpop.f32.mrb[42].mxu1  ;;  %v2718_v2 = vpop.f32.mrb[43].mxu0 }
 0x159   : > { %v1965_v3 = vadd.f32 %v2716_v59, %v1900_v53  ;;  %v2719_v50 = vadd.f32 %v2718_v2, %v2717_v63  ;;  %v2758_v4 = vpop.f32.mrb[43].mxu1 }
 0x15a   : > { %v2759_v61 = vadd.f32 %v2758_v4, %v2757_v1 }
 0x15b   : > { %v3465_v6 = vadd.f32 %v2756_v0, %v1965_v3  ;;  %v1968_v7 = vadd.f32 %v2719_v50, %v3453_v5 }
 0x15d   : > { %v3468_v52 = vadd.f32 %v2759_v61, %v1968_v7  ;;  %v2720_v8 = vpop.f32.mrb[44].mxu0 }
 0x15e   : > { %v2760_v10 = vpop.f32.mrb[44].mxu1  ;;  %v2721_v12 = vpop.f32.mrb[45].mxu0 }
 0x15f   : > { %v2722_v13 = vadd.f32 %v2721_v12, %v2720_v8  ;;  %v2761_v14 = vpop.f32.mrb[45].mxu1  ;;  %v2723_v15 = vpop.f32.mrb[46].mxu0 }
 0x160   : > { %v2762_v16 = vadd.f32 %v2761_v14, %v2760_v10  ;;  %v2763_v18 = vpop.f32.mrb[46].mxu1  ;;  %v2724_v19 = vpop.f32.mrb[47].mxu0 }
 0x161   : > { %v1973_v62 = vadd.f32 %v2722_v13, %v1908_v21  ;;  %v2725_v53 = vadd.f32 %v2724_v19, %v2723_v15  ;;  %v2764_v22 = vpop.f32.mrb[47].mxu1 }
 0x162   : > { %v2765_v11 = vadd.f32 %v2764_v22, %v2763_v18 }
 0x163   : > { %v3470_v24 = vadd.f32 %v2762_v16, %v1973_v62  ;;  %v1976_v25 = vadd.f32 %v2725_v53, %v3455_v23 }
 0x165   : > { %v3473_v5 = vadd.f32 %v2765_v11, %v1976_v25  ;;  %v2782_v26 = vpop.f32.mrb[48].mxu0 }
 0x166   : > { %v2822_v27 = vpop.f32.mrb[48].mxu1  ;;  %v2783_v28 = vpop.f32.mrb[49].mxu0 }
 0x167   : > { %v2784_v29 = vadd.f32 %v2783_v28, %v2782_v26  ;;  %v2823_v31 = vpop.f32.mrb[49].mxu1  ;;  %v2785_v32 = vpop.f32.mrb[50].mxu0 }
 0x168   : > { %v2824_v33 = vadd.f32 %v2823_v31, %v2822_v27  ;;  %v2825_v35 = vpop.f32.mrb[50].mxu1  ;;  %v2786_v37 = vpop.f32.mrb[51].mxu0 }
 0x169   : > { %v2079_v17 = vadd.f32 %v2784_v29, %v2014_v38  ;;  %v2787_v21 = vadd.f32 %v2786_v37, %v2785_v32  ;;  %v2826_v39 = vpop.f32.mrb[51].mxu1 }
 0x16a   : > { %v2827_v20 = vadd.f32 %v2826_v39, %v2825_v35 }
 0x16b   : > { %v2144_v41 = vadd.f32 %v2824_v33, %v2079_v17  ;;  %v2082_v42 = vadd.f32 %v2787_v21, %v3458_v40 }
 0x16d   : > { %v2147_v43 = vadd.f32 %v2827_v20, %v2082_v42  ;;  %v2788_v23 = vpop.f32.mrb[52].mxu0  ;;  %v2174_v47 = vmax.f32 %v2144_v41, 0.0 }
 0x16e   : > { %v2828_v44 = vpop.f32.mrb[52].mxu1  ;;  %v2789_v46 = vpop.f32.mrb[53].mxu0 }
 0x16f   : > { %v2175_v48 = vmax.f32 %v2147_v43, 0.0  ;;  %v2790_v49 = vadd.f32 %v2789_v46, %v2788_v23  ;;  %v2829_v30 = vpop.f32.mrb[53].mxu1  ;;  %v2791_v51 = vpop.f32.mrb[54].mxu0  ;;  %v269_v43 = vld [vmem:[%s3501_s3] sm:$0x7] }
 0x170   : > { %v2830_v45 = vadd.f32 %v2829_v30, %v2828_v44  ;;  %v2831_v34 = vpop.f32.mrb[54].mxu1  ;;  %v2792_v55 = vpop.f32.mrb[55].mxu0 }
 0x171   : > { %v2875_v56 = vpack.c.bf16 %v2175_v48, %v2174_v47  ;;  %v2087_v38 = vadd.f32 %v2790_v49, %v3460_v54  ;;  %v2793_v57 = vadd.f32 %v2792_v55, %v2791_v51  ;;  %v2832_v58 = vpop.f32.mrb[55].mxu1 }
 0x172   : > { %v2833_v59 = vadd.f32 %v2832_v58, %v2831_v34 }
 0x173   : > { %v2152_v60 = vadd.f32 %v2830_v45, %v2087_v38  ;;  %v2090_v40 = vadd.f32 %v2793_v57, %v3463_v36  ;;  %2876 = vmatpush3.bf16.msra.mxu0 %v2875_v56 }
 0x174   : > { %2877 = vmatprep.subr.bf16.mxu0 %v3041_v9 }
 0x175   : > { %v2155_v63 = vadd.f32 %v2833_v59, %v2090_v40  ;;  %v2794_v0 = vpop.f32.mrb[56].mxu0  ;;  %v2176_v3 = vmax.f32 %v2152_v60, 0.0 }
 0x176   : > { %v2834_v1 = vpop.f32.mrb[56].mxu1  ;;  %v2795_v2 = vpop.f32.mrb[57].mxu0 }
 0x177   : > { %v2177_v50 = vmax.f32 %v2155_v63, 0.0  ;;  %v2796_v4 = vadd.f32 %v2795_v2, %v2794_v0  ;;  %v2835_v61 = vpop.f32.mrb[57].mxu1  ;;  %v2797_v7 = vpop.f32.mrb[58].mxu0 }
 0x178   : > { %v2836_v8 = vadd.f32 %v2835_v61, %v2834_v1  ;;  %v2837_v54 = vpop.f32.mrb[58].mxu1  ;;  %v2798_v10 = vpop.f32.mrb[59].mxu0 }
 0x179   : > { %v2878_v12 = vpack.c.bf16 %v2177_v50, %v2176_v3  ;;  %v2095_v13 = vadd.f32 %v2796_v4, %v3465_v6  ;;  %v2799_v14 = vadd.f32 %v2798_v10, %v2797_v7  ;;  %v2838_v36 = vpop.f32.mrb[59].mxu1 }
 0x17a   : > { %v2839_v15 = vadd.f32 %v2838_v36, %v2837_v54 }
 0x17b   : > { %v2160_v16 = vadd.f32 %v2836_v8, %v2095_v13  ;;  %v2098_v18 = vadd.f32 %v2799_v14, %v3468_v52  ;;  %2879 = vmatpush3.bf16.msra.mxu0 %v2878_v12 }
 0x17c   : > { %2880 = vmatprep.subr.bf16.mxu0 %v3041_v9 }
 0x17d   : > { %v2163_v19 = vadd.f32 %v2839_v15, %v2098_v18  ;;  %v2800_v62 = vpop.f32.mrb[60].mxu0  ;;  %v2178_v11 = vmax.f32 %v2160_v16, 0.0 }
 0x17e   : > { %v2840_v53 = vpop.f32.mrb[60].mxu1  ;;  %v2801_v22 = vpop.f32.mrb[61].mxu0 }
 0x17f   : > { %v2179_v25 = vmax.f32 %v2163_v19, 0.0  ;;  %v2802_v26 = vadd.f32 %v2801_v22, %v2800_v62  ;;  %v2841_v27 = vpop.f32.mrb[61].mxu1  ;;  %v2803_v28 = vpop.f32.mrb[62].mxu0 }
 0x180   : > { %v2842_v29 = vadd.f32 %v2841_v27, %v2840_v53  ;;  %v2843_v6 = vpop.f32.mrb[62].mxu1  ;;  %v2804_v31 = vpop.f32.mrb[63].mxu0 }
 0x181   : > { %v2881_v32 = vpack.c.bf16 %v2179_v25, %v2178_v11  ;;  %v2103_v33 = vadd.f32 %v2802_v26, %v3470_v24  ;;  %v2805_v35 = vadd.f32 %v2804_v31, %v2803_v28  ;;  %v2844_v52 = vpop.f32.mrb[63].mxu1 }
 0x182   : > { %v2845_v37 = vadd.f32 %v2844_v52, %v2843_v6 }
 0x183   : > { %v2168_v17 = vadd.f32 %v2842_v29, %v2103_v33  ;;  %v2106_v21 = vadd.f32 %v2805_v35, %v3473_v5  ;;  %2882 = vmatpush3.bf16.msra.mxu0 %v2881_v32 }
 0x184   : > { %2883 = vmatprep.subr.bf16.mxu0 %v3041_v9 }
 0x185   : > { %v2171_v39 = vadd.f32 %v2845_v37, %v2106_v21  ;;  %v2180_v20 = vmax.f32 %v2168_v17, 0.0 }
 0x187   : > { %v2181_v41 = vmax.f32 %v2171_v39, 0.0 }
 0x189   : > { %v2884_v42 = vpack.c.bf16 %v2181_v41, %v2180_v20 }
 0x18b   : > { %2885 = vmatpush3.bf16.msra.mxu0 %v2884_v42 }
 0x18e   : > { %2872 = vmatmul.mubr.msk.f32.vlgmr.msra.gmra.mrb[64].mxu0 %vm2182_vm1, %v269_v43 }
 0x261   : > { %v2252_v24 = vpop.f32.mrb[64].mxu0 }
 0x262   : > { %v2257_v23 = vsel %vm2256_vm2, %v2252_v24, -inf  ;;  %v2873_v5 = vpop.f32.mrb[65].mxu0 }
 0x263   : > { %2258 = vmax.xlane.f32.xlu0 %v2257_v23 }
 0x2f0   : > { %v2259_v44 = vpop.xlane.xlu0 %2258 }
 0x2f1   : > { %v2260_v9 = vsub.f32 %v2252_v24, %v2259_v44 }
 0x2f3   : > { %v2261_v46 = vmul.f32 1.442695, %v2260_v9 }
 0x2f5   : > { %3028 = vpow2.f32 %v2261_v46 }
 0x2ff   : > { %v3029_v47 = vpop.eup %3028 }
 0x300   : > { %v2263_v48 = vsel %vm2256_vm2, %v3029_v47, 0.0 }
 0x301   : > { %2264 = vadd.xlane.f32.xlu1 %v2263_v48 }
 0x38e   : > { %v2265_v49 = vpop.xlane.xlu1 %2264 }
 0x38f   : > { %3030 = vrcp.f32 %v2265_v49 }
 0x399   : > { %v3031_v30 = vpop.eup %3030 }
 0x39a   : > { %v2267_v51 = vmul.f32 %v3031_v30, %v3029_v47 }
 0x39c   : > { %2268 = vst.msk [vmem:[%s195_s30] sm:$0x7] %vm2256_vm2, %v2267_v51 }
 0x39d PF: > { %s14_s15 = sadd.s32 1, %s3038_s15  }
 0x39e   : > { %p11_p4 = scmp.ge.s32.totalorder %s14_s15, 4  }
 0x3a0   :  { %13 = sbr.rel (!%p11_p4) target bundleno = 1 (0x1), region = 66 }

</bundles_post_ra>
